<compile_context>
chip_gen: v5e
topology: v5e:2x2
jax: 0.10.0
libtpu: 0.0.40
codegen_flags: <defaults>
</compile_context>

<pallas_src>
import functools

import jax
import jax.numpy as jnp
from jax.experimental import pallas as pl
from jax.experimental.pallas import tpu as pltpu


def _choose_tile(size, quantum, target):
    """Largest multiple of `quantum` that divides `size` and is <= target.
    Falls back to the full extent when `size` is not a multiple of `quantum`
    (full-extent blocks are always legal on TPU)."""
    if size % quantum != 0:
        return size
    t = min(size, max(quantum, (target // quantum) * quantum))
    while size % t != 0:
        t -= quantum
    return t


def _dropout_kernel(seed_ref, thr_ref, x_ref, o_ref, *, row_blk, lane_blk,
                    total_lanes):
    # Global element coordinates of this tile (so every grid step draws an
    # independent random stream).
    r0 = pl.program_id(0) * row_blk
    c0 = pl.program_id(1) * lane_blk
    rows = jax.lax.broadcasted_iota(jnp.int32, (row_blk, lane_blk), 0) + r0
    cols = jax.lax.broadcasted_iota(jnp.int32, (row_blk, lane_blk), 1) + c0
    idx = rows * jnp.int32(total_lanes) + cols

    # Counter-based PRNG: murmur3 fmix32 of (element index ^ mixed seed).
    # int32 arithmetic wraps mod 2^32 and logical right shifts are emulated as
    # (arithmetic shift & mask), so this is bit-identical to the uint32 mixer.
    # Pure elementwise int32 ops -> lowers on Mosaic and in interpret mode.
    seed = seed_ref[0]
    h = idx ^ (seed * jnp.int32(-1640531527))            # 0x9E3779B9
    h = h ^ ((h >> 16) & jnp.int32(0x0000FFFF))
    h = h * jnp.int32(-2048144789)                       # 0x85EBCA6B
    h = h ^ ((h >> 13) & jnp.int32(0x0007FFFF))
    h = h * jnp.int32(-1028477387)                       # 0xC2B2AE35
    h = h ^ ((h >> 16) & jnp.int32(0x0000FFFF))

    # Uniform 31-bit value vs. per-row threshold: P(keep) = thr / 2^31.
    bits = (h >> 1) & jnp.int32(0x7FFFFFFF)
    keep = bits < thr_ref[...]                           # (row_blk,1) broadcasts over lanes
    x = x_ref[...]
    o_ref[...] = jnp.where(keep, x, jnp.zeros_like(x))   # dropped -> 0, no rescale


def l2_dynamic_dropout(x, weights, seed, *, initial_rate=0.1, max_rate=0.5,
                       training=True):
    """x: (N, C, H, W) float (NCHW like the PyTorch module).
       weights: (C, K) — rows indexed by the channel axis of x."""
    if not training:
        return x

    N, C, H, W = x.shape
    R, L = N * C, H * W

    # ---- per-channel dropout rate from weight L2 norms (O(C*K): do it in JAX) ----
    w = weights.astype(jnp.float32)
    l2 = jnp.sqrt(jnp.sum(w * w, axis=1))                                # (C,)
    l2_min = jnp.min(l2)
    denom = jnp.maximum(jnp.max(l2) - l2_min, jnp.float32(1e-12))        # NaN guard
    normalized = (l2 - l2_min) / denom
    rates = initial_rate + (max_rate - initial_rate) * (1.0 - normalized)
    keep = jnp.clip(1.0 - rates, 0.0, 1.0)                               # (C,) keep prob

    # 31-bit integer thresholds: P(keep) = thr / 2^31 (clamped below 2^31).
    thr_c = jnp.minimum(keep * jnp.float32(2.0 ** 31),
                        jnp.float32(2.0 ** 31 - 128.0)).astype(jnp.int32)
    thr = jnp.tile(thr_c, (N,)).reshape(R, 1)            # row r -> channel r % C

    # ---- free layout change: (N, C, H, W) -> (N*C, H*W); no transposes ----
    x2 = x.reshape(R, L)
    seed_arr = jnp.asarray([seed], dtype=jnp.int32)

    row_blk = _choose_tile(R, 8, 256)
    lane_blk = _choose_tile(L, 128, 2048)                # lane-dense, ~2 MiB f32 tiles
    grid = (R // row_blk, L // lane_blk)

    kernel = functools.partial(_dropout_kernel, row_blk=row_blk,
                               lane_blk=lane_blk, total_lanes=L)

    out2 = pl.pallas_call(
        kernel,
        out_shape=jax.ShapeDtypeStruct((R, L), x.dtype),
        grid=grid,
        in_specs=[
            pl.BlockSpec(memory_space=pltpu.MemorySpace.SMEM),        # seed (1,)
            pl.BlockSpec((row_blk, 1), lambda i, j: (i, 0)),          # per-row thresholds
            pl.BlockSpec((row_blk, lane_blk), lambda i, j: (i, j)),   # x slab tile
        ],
        out_specs=pl.BlockSpec((row_blk, lane_blk), lambda i, j: (i, j)),
        compiler_params=pltpu.CompilerParams(
            dimension_semantics=("parallel", "parallel"),
            vmem_limit_bytes=32 * 1024 * 1024),
    )(seed_arr, thr, x2)

    return out2.reshape(N, C, H, W)


if __name__ == "__main__":
    key = jax.random.PRNGKey(0)
    kx, kw = jax.random.split(key)

    N, C, H, W = 2, 4, 16, 16
    K = 8
    x = jax.random.normal(kx, (N, C, H, W), dtype=jnp.float32)
    weights = jax.random.normal(kw, (C, K), dtype=jnp.float32)

    out = l2_dynamic_dropout(x, weights, seed=1234,
                             initial_rate=0.1, max_rate=0.5, training=True)
    out = jax.block_until_ready(out)

    assert out.shape == x.shape and out.dtype == x.dtype
    # surviving elements equal the input exactly; dropped elements are zero
    kept = out != 0.0
    assert bool(jnp.all(jnp.where(kept, out == x, out == 0.0)))
    # keep-probs lie in [0.5, 0.9]; over 2048 elements both outcomes occur
    frac_kept = float(jnp.mean(kept.astype(jnp.float32)))
    assert 0.2 < frac_kept < 0.99

    print("KERNEL_OK")
</pallas_src>

<mosaic_0001>
module attributes {stable_mosaic.version = 11 : i64} {
  func.func @_dropout_kernel(%arg0: i32, %arg1: i32, %arg2: memref<1xi32, #tpu.memory_space<smem>>, %arg3: memref<8x1xi32, #tpu.memory_space<vmem>>, %arg4: memref<8x256xf32, #tpu.memory_space<vmem>>, %arg5: memref<8x256xf32, #tpu.memory_space<vmem>>) attributes {dimension_semantics = [#tpu.dimension_semantics<parallel>, #tpu.dimension_semantics<parallel>], iteration_bounds = array<i64: 1, 1>, scalar_prefetch = 0 : i64, scratch_operands = 0 : i64, tpu.core_type = #tpu.core_type<tc>, window_params = [{transform_indices = @transform_0, window_bounds = array<i64: 1>}, {transform_indices = @transform_1, window_bounds = array<i64: 8, 1>}, {transform_indices = @transform_2, window_bounds = array<i64: 8, 256>}, {transform_indices = @transform_3, window_bounds = array<i64: 8, 256>}]} {
    %c8_i32 = arith.constant 8 : i32
    %0 = arith.muli %arg0, %c8_i32 : i32
    %c256_i32 = arith.constant 256 : i32
    %1 = arith.muli %arg1, %c256_i32 : i32
    %2 = tpu.iota {dimensions = array<i32: 0>} : vector<8x256xi32>
    %3 = vector.broadcast %0 : i32 to vector<8x256xi32>
    %4 = arith.addi %2, %3 : vector<8x256xi32>
    %5 = tpu.iota {dimensions = array<i32: 1>} : vector<8x256xi32>
    %6 = vector.broadcast %1 : i32 to vector<8x256xi32>
    %7 = arith.addi %5, %6 : vector<8x256xi32>
    %c256_i32_0 = arith.constant 256 : i32
    %8 = vector.broadcast %c256_i32_0 : i32 to vector<8x256xi32>
    %9 = arith.muli %4, %8 : vector<8x256xi32>
    %10 = arith.addi %9, %7 : vector<8x256xi32>
    %c0 = arith.constant 0 : index
    %11 = memref.load %arg2[%c0] : memref<1xi32, #tpu.memory_space<smem>>
    %c-1640531527_i32 = arith.constant -1640531527 : i32
    %12 = arith.muli %11, %c-1640531527_i32 : i32
    %13 = vector.broadcast %12 : i32 to vector<8x256xi32>
    %14 = arith.xori %10, %13 : vector<8x256xi32>
    %c16_i32 = arith.constant 16 : i32
    %15 = vector.broadcast %c16_i32 : i32 to vector<8x256xi32>
    %16 = arith.shrsi %14, %15 : vector<8x256xi32>
    %c65535_i32 = arith.constant 65535 : i32
    %17 = vector.broadcast %c65535_i32 : i32 to vector<8x256xi32>
    %18 = arith.andi %16, %17 : vector<8x256xi32>
    %19 = arith.xori %14, %18 : vector<8x256xi32>
    %c-2048144789_i32 = arith.constant -2048144789 : i32
    %20 = vector.broadcast %c-2048144789_i32 : i32 to vector<8x256xi32>
    %21 = arith.muli %19, %20 : vector<8x256xi32>
    %c13_i32 = arith.constant 13 : i32
    %22 = vector.broadcast %c13_i32 : i32 to vector<8x256xi32>
    %23 = arith.shrsi %21, %22 : vector<8x256xi32>
    %c524287_i32 = arith.constant 524287 : i32
    %24 = vector.broadcast %c524287_i32 : i32 to vector<8x256xi32>
    %25 = arith.andi %23, %24 : vector<8x256xi32>
    %26 = arith.xori %21, %25 : vector<8x256xi32>
    %c-1028477387_i32 = arith.constant -1028477387 : i32
    %27 = vector.broadcast %c-1028477387_i32 : i32 to vector<8x256xi32>
    %28 = arith.muli %26, %27 : vector<8x256xi32>
    %c16_i32_1 = arith.constant 16 : i32
    %29 = vector.broadcast %c16_i32_1 : i32 to vector<8x256xi32>
    %30 = arith.shrsi %28, %29 : vector<8x256xi32>
    %c65535_i32_2 = arith.constant 65535 : i32
    %31 = vector.broadcast %c65535_i32_2 : i32 to vector<8x256xi32>
    %32 = arith.andi %30, %31 : vector<8x256xi32>
    %33 = arith.xori %28, %32 : vector<8x256xi32>
    %c1_i32 = arith.constant 1 : i32
    %34 = vector.broadcast %c1_i32 : i32 to vector<8x256xi32>
    %35 = arith.shrsi %33, %34 : vector<8x256xi32>
    %c2147483647_i32 = arith.constant 2147483647 : i32
    %36 = vector.broadcast %c2147483647_i32 : i32 to vector<8x256xi32>
    %37 = arith.andi %35, %36 : vector<8x256xi32>
    %c0_3 = arith.constant 0 : index
    %c0_4 = arith.constant 0 : index
    %38 = vector.load %arg3[%c0_3, %c0_4] : memref<8x1xi32, #tpu.memory_space<vmem>>, vector<8x1xi32>
    %39 = vector.broadcast %38 : vector<8x1xi32> to vector<8x256xi32>
    %40 = arith.cmpi slt, %37, %39 : vector<8x256xi32>
    %c0_5 = arith.constant 0 : index
    %c0_6 = arith.constant 0 : index
    %41 = vector.load %arg4[%c0_5, %c0_6] : memref<8x256xf32, #tpu.memory_space<vmem>>, vector<8x256xf32>
    %cst = arith.constant 0.000000e+00 : f32
    %42 = vector.broadcast %cst : f32 to vector<8x256xf32>
    %43 = arith.select %40, %41, %42 : vector<8x256xi1>, vector<8x256xf32>
    %c0_7 = arith.constant 0 : index
    %c0_8 = arith.constant 0 : index
    %44 = vector.load %arg5[%c0_7, %c0_8] : memref<8x256xf32, #tpu.memory_space<vmem>>, vector<8x256xf32>
    tpu.vector_store %arg5[%c0_7, %c0_8], %43 {strides = array<i32>} : memref<8x256xf32, #tpu.memory_space<vmem>>, vector<8x256xf32>,
    return
  }
  func.func @transform_0(%arg0: i32, %arg1: i32) -> i32 {
    %c0_i32 = arith.constant 0 : i32
    %c0_i32_0 = arith.constant 0 : i32
    return %c0_i32 : i32
  }
  func.func @transform_1(%arg0: i32, %arg1: i32) -> (i32, i32) {
    %c0_i32 = arith.constant 0 : i32
    %c0_i32_0 = arith.constant 0 : i32
    return %arg0, %c0_i32 : i32, i32
  }
  func.func @transform_2(%arg0: i32, %arg1: i32) -> (i32, i32) {
    %c0_i32 = arith.constant 0 : i32
    return %arg0, %arg1 : i32, i32
  }
  func.func @transform_3(%arg0: i32, %arg1: i32) -> (i32, i32) {
    %c0_i32 = arith.constant 0 : i32
    return %arg0, %arg1 : i32, i32
  }
}

</mosaic_0001>

<bundles_post_ra>
// kernel: tpu_custom_call.1
= control target key start
LH: loop header
LB: loop body
LE: loop exit
PB: predicated region body
PF: predicated region fallthrough
CT: control target
= control target key end

     0   :  { %9 = vsyncpa [#allocation4], 0  ;;  %s204_s0 = inlined_call_operand.<no memory space> [shape: s32[1], index: 0, kind: input, shape index: {}]   ;;  %s205_s1 = inlined_call_operand.vmem [shape: s32[8,1], index: 1, kind: input, shape index: {}]   ;;  %s206_s2 = inlined_call_operand.hbm [shape: f32[8,256], index: 2, kind: input, shape index: {}]   ;;  %s207_s3 = inlined_call_operand.hbm [shape: f32[8,256], index: 3, kind: output, shape index: {}]  }
   0x1   :  { %10 = vsyncpa [#allocation5], 0  ;;  %s20_s14 = sshll.u32 %s206_s2, 4  ;;  %s169_s15 = smov [#allocation3]   ;;  %s21_s14 = int_to_ptr.hbm [resolvable:$true] %s20_s14 }
   0x2   :  { %s22_s16 = sshll.u32 %s169_s15, 4  ;;  %s23_s16 = int_to_ptr.vmem [resolvable:$true] %s22_s16 }
   0x3   :  { %25 = dma.hbm_to_vmem [thread:$0]  %s21_s14, 256, %s23_s16, [#allocation4]  }
   0x4   :  { %165 = dma.done.wait [#allocation4], 256  }
   0x5   :  { %166 = vsyncadd [#allocation4], 4294967040  ;;  %v170_v0 = vmov 0   ;;  %v76_v1 = vld [vmem:[%s205_s1] sm:$0xff]  ;;  %v32_v2 = vlaneseq  ;;  %s46_s20 = smul.u32 2654435769, %s204_s0 }
   0x6   :  { %116 = vset.pattern.permute.xlu0 %v170_v0  ;;  %v82_v30 = vld [vmem:[#allocation3] sm:$0xff]  ;;  %v83_v31 = vld [vmem:[#allocation3 + $0x8] sm:$0xff]  ;;  %s171_s0 = smov [#allocation6]   ;;  %s95_s23 = sshll.u32 %s207_s3, 4  ;;  %s96_s23 = int_to_ptr.hbm [resolvable:$true] %s95_s23 }
   0x7   :  { %78 = vperm.xlu0 %116, %v76_v1   ;;  %v33_v3 = vshrl.u32 %v32_v2, 7  ;;  %v37_v4 = vand.u32 127, %v32_v2  ;;  %v47_v9 = vstv %s46_s20  ;;  %s93_s1 = sshll.u32 %s171_s0, 4  ;;  %s94_s1 = int_to_ptr.vmem [resolvable:$true] %s93_s1 }
   0x9   :  { %v38_v5 = vadd.s32 128, %v37_v4  ;;  %v42_v6 = vmul.u32 256, %v33_v3 }
   0xb   :  { %v43_v7 = vadd.s32 %v42_v6, %v37_v4  ;;  %v44_v8 = vadd.s32 %v42_v6, %v38_v5 }
   0xd   :  { %v48_v10 = vxor.u32 %v47_v9, %v43_v7  ;;  %v49_v11 = vxor.u32 %v47_v9, %v44_v8 }
   0xf   :  { %v105_v12 = vshrl.u32 %v48_v10, 16  ;;  %v106_v13 = vshrl.u32 %v49_v11, 16 }
  0x11   :  { %v54_v14 = vxor.u32 %v105_v12, %v48_v10  ;;  %v55_v15 = vxor.u32 %v106_v13, %v49_v11 }
  0x13   :  { %v56_v16 = vmul.u32 2246822507, %v54_v14  ;;  %v57_v17 = vmul.u32 2246822507, %v55_v15 }
  0x15   :  { %v107_v18 = vshrl.u32 %v56_v16, 13  ;;  %v108_v19 = vshrl.u32 %v57_v17, 13 }
  0x17   :  { %v62_v20 = vxor.u32 %v107_v18, %v56_v16  ;;  %v63_v21 = vxor.u32 %v108_v19, %v57_v17 }
  0x19   :  { %v64_v22 = vmul.u32 3266489909, %v62_v20  ;;  %v65_v23 = vmul.u32 3266489909, %v63_v21 }
  0x1b   :  { %v109_v24 = vshrl.u32 %v64_v22, 16  ;;  %v110_v25 = vshrl.u32 %v65_v23, 16 }
  0x1d   :  { %v70_v26 = vxor.u32 %v109_v24, %v64_v22  ;;  %v71_v27 = vxor.u32 %v110_v25, %v65_v23 }
  0x1f   :  { %v111_v28 = vshrl.u32 %v70_v26, 1  ;;  %v112_v29 = vshrl.u32 %v71_v27, 1 }
  0x79   :  { %v79_v32 = vpop.permute.xlu0 %78 }
  0x7a   :  { %vm80_vm0 = vcmp.lt.s32.totalorder %v111_v28, %v79_v32  ;;  %vm81_vm1 = vcmp.lt.s32.totalorder %v112_v29, %v79_v32 }
  0x7b   :  { %v84_v33 = vsel %vm80_vm0, %v82_v30, 0.0  ;;  %v85_v34 = vsel %vm81_vm1, %v83_v31, 0.0 }
  0x7c   :  { %86 = vst [vmem:[#allocation6] sm:$0xff] %v84_v33 }
  0x7d   :  { %87 = vst [vmem:[#allocation6 + $0x8] sm:$0xff] %v85_v34 }
  0x7e   :  { %98 = dma.vmem_to_hbm [thread:$0]  %s94_s1, 256, %s96_s23, [#allocation5]  }
  0x7f   :  { %167 = dma.done.wait [#allocation5], 256  }
  0x80   :  { %168 = vsyncadd [#allocation5], 4294967040 }
  0x81   :  { %103 = vsyncpa [#allocation4], 1 }
  0x82   :  { %104 = vsyncpa [#allocation5], 1 }

</bundles_post_ra>
